<compile_context>
chip_gen: v7x
topology: tpu7x:2x2x1
jax: 0.10.0
libtpu: 0.0.40
codegen_flags: <defaults>
</compile_context>

<pallas_src>
import jax
import jax.numpy as jnp
from jax.experimental import pallas as pl
from jax.experimental.pallas import tpu as pltpu


def _round_up(x, m):
    return (x + m - 1) // m * m


def _epilogue(h, b1_ref, g_ref, beta_ref, w2_ref, b2_ref, o_ref):
    """bias + ReLU + BertLayerNorm(eps=1e-12) + Linear2, h is f32 (tm, H)."""
    hdim = h.shape[-1]
    h = h + b1_ref[...].astype(jnp.float32)
    h = jnp.maximum(h, 0.0)

    # LayerNorm via E[h] / E[h^2]: both reductions depend only on h (overlaps
    # the MXU drain); biased variance, eps=1e-12, matching BertLayerNorm.
    inv_n = 1.0 / hdim
    s1 = jnp.sum(h, axis=-1, keepdims=True)
    s2 = jnp.sum(h * h, axis=-1, keepdims=True)
    mean = s1 * inv_n
    var = jnp.maximum(s2 * inv_n - mean * mean, 0.0)
    inv = jax.lax.rsqrt(var + 1e-12)                      # EUP (free slot)
    ln = (h - mean) * inv * g_ref[...].astype(jnp.float32) \
         + beta_ref[...].astype(jnp.float32)

    # Linear 2 (lane-padded output). Cast activations to the weight dtype so
    # bf16 weights use the native bf16 MXU path; accumulate in f32.
    out = jnp.dot(ln.astype(w2_ref.dtype), w2_ref[...],
                  preferred_element_type=jnp.float32)
    out = out + b2_ref[...].astype(jnp.float32)
    o_ref[...] = out.astype(o_ref.dtype)


def _region_cls_kernel(x_ref, w1_ref, b1_ref, g_ref, beta_ref, w2_ref, b2_ref,
                       o_ref):
    # Resident-weight path: x (tm, H), w1 (H, H) fully in VMEM.
    # Cast the small activation tile to the weight dtype (NOT the (H,H) weight
    # tile to f32) so bf16 weights run the native bf16 MXU path.
    h = jnp.dot(x_ref[...].astype(w1_ref.dtype), w1_ref[...],
                preferred_element_type=jnp.float32)
    _epilogue(h, b1_ref, g_ref, beta_ref, w2_ref, b2_ref, o_ref)


def _region_cls_kernel_ktiled(x_ref, w1_ref, b1_ref, g_ref, beta_ref, w2_ref,
                              b2_ref, o_ref, acc_ref):
    # K-tiled path: x (tm, tk), w1 (tk, H) streamed; acc (tm, H) f32 scratch.
    k = pl.program_id(1)

    @pl.when(k == 0)
    def _():
        acc_ref[...] = jnp.zeros_like(acc_ref)

    acc_ref[...] += jnp.dot(x_ref[...].astype(w1_ref.dtype), w1_ref[...],
                            preferred_element_type=jnp.float32)

    @pl.when(k == pl.num_programs(1) - 1)
    def _():
        _epilogue(acc_ref[...], b1_ref, g_ref, beta_ref, w2_ref, b2_ref, o_ref)


def region_classification(x, params, *, tm=512, tk=None, matmul_dtype=None):
    """x: (batch, seq, hidden). Returns (batch, seq, label_dim).

    matmul_dtype: optionally force GEMM operand dtype (e.g. jnp.bfloat16) for
    the native bf16 MXU path; accumulation stays f32. Default keeps the
    parameters' dtype (exact semantics of the PyTorch module for f32 params).
    """
    w1, b1, gamma, beta, w2, b2 = (
        params["w1"], params["b1"], params["gamma"], params["beta"],
        params["w2"], params["b2"],
    )
    B, S, H = x.shape
    L = w2.shape[1]
    M = B * S
    out_dtype = x.dtype

    if matmul_dtype is not None:
        w1 = w1.astype(matmul_dtype)
        w2 = w2.astype(matmul_dtype)
        if jnp.dtype(matmul_dtype).itemsize < jnp.dtype(x.dtype).itemsize:
            x = x.astype(matmul_dtype)     # halve streamed activation bytes

    x2d = x.reshape(M, H)

    x_item = jnp.dtype(x2d.dtype).itemsize
    o_item = jnp.dtype(out_dtype).itemsize
    w1_item = jnp.dtype(w1.dtype).itemsize
    w2_item = jnp.dtype(w2.dtype).itemsize

    # Lane-dense output: pad the label dim to a multiple of 128.
    Lp = _round_up(max(L, 1), 128)
    if Lp != L:
        w2 = jnp.pad(w2, ((0, 0), (0, Lp - L)))
        b2 = jnp.pad(b2, ((0, 0), (0, Lp - L)))

    # ---- Generation-aware VMEM budgets -------------------------------------
    try:
        vmem_cap = int(pltpu.get_tpu_info().vmem_capacity_bytes)
    except Exception:
        vmem_cap = 128 << 20
    if vmem_cap <= (64 << 20):          # v7x: 64 MiB physical -> leave headroom
        work_budget = 48 << 20
        vmem_limit_cap = 56 << 20
    else:                               # v5e / v6e: 128 MiB physical
        work_budget = 100 << 20
        vmem_limit_cap = 116 << 20

    # Guarantee >= 2 row tiles so the "parallel" axis can shard across v7x's
    # two TensorCores (plain Python math, no pl.* at trace time).
    tm = max(8, min(_round_up(tm, 8), _round_up((M + 1) // 2, 8)))

    def _vmem_resident(t):
        # weights single-buffered (Buffered(1)); activation/output tiles 2x.
        act = 2 * t * (H * x_item + Lp * o_item)
        wts = H * H * w1_item + H * Lp * w2_item + (3 * H + Lp) * 4
        return act + wts

    def _vmem_ktiled(t, k):
        act = 2 * t * (k * x_item + Lp * o_item)          # x + out tiles (2x)
        w1s = 2 * k * H * w1_item                         # streamed w1 slabs (2x)
        res = H * Lp * w2_item + (3 * H + Lp) * 4         # resident w2 + vectors
        return act + w1s + res + t * H * 4                # + f32 accumulator

    # Shrink tm only down to 256 — below that, K-tiling is the right tool.
    while tm > 256 and _vmem_resident(tm) > work_budget:
        tm = max(256, tm // 2)

    if tk is not None and 0 < tk < H and H % tk == 0 and tk % 128 == 0:
        use_k_tiling = True                               # explicit override
    elif _vmem_resident(tm) > work_budget and H % 128 == 0 and H > 128:
        use_k_tiling = True
        tk = None
    else:
        use_k_tiling = False
        # TODO(synk): H that is not a multiple of 128 and too large for weight
        # residency would need contraction-dim zero padding before K-tiling.

    if use_k_tiling and tk is None:
        tk = 128
        for cand in (2048, 1024, 512, 256, 128):
            if H % cand == 0 and cand < H and _vmem_ktiled(tm, cand) <= work_budget:
                tk = cand
                break
        while tm > 64 and _vmem_ktiled(tm, tk) > work_budget:
            tm = max(64, tm // 2)

    Mp = _round_up(M, tm)
    if Mp != M:
        x2d = jnp.pad(x2d, ((0, Mp - M), (0, 0)))

    est = _vmem_ktiled(tm, tk) if use_k_tiling else _vmem_resident(tm)
    vmem_limit = int(min(max(est + est // 2 + (4 << 20), 32 << 20), vmem_limit_cap))

    cost = pl.CostEstimate(
        flops=2 * Mp * H * H + 2 * Mp * H * Lp,
        transcendentals=Mp,                                # one rsqrt per row
        bytes_accessed=(Mp * H * x_item + Mp * Lp * o_item
                        + H * H * w1_item + H * Lp * w2_item
                        + (3 * H + Lp) * 4),
    )

    def _const_spec(shape, idx_map, single_buffer):
        # Loop-invariant operand: constant index_map; single-buffer to halve
        # its VMEM footprint (double-buffering it would only waste VMEM).
        if single_buffer:
            return pl.BlockSpec(shape, idx_map, pipeline_mode=pl.Buffered(1))
        return pl.BlockSpec(shape, idx_map)

    def _call(single_buffer):
        if not use_k_tiling:
            grid = (Mp // tm,)
            const = lambda i: (0, 0)
            in_specs = [
                pl.BlockSpec((tm, H), lambda i: (i, 0)),          # x tile (pipelined)
                _const_spec((H, H), const, single_buffer),        # w1 (resident)
                _const_spec((1, H), const, single_buffer),        # b1
                _const_spec((1, H), const, single_buffer),        # gamma
                _const_spec((1, H), const, single_buffer),        # beta
                _const_spec((H, Lp), const, single_buffer),       # w2 (padded, resident)
                _const_spec((1, Lp), const, single_buffer),       # b2 (padded)
            ]
            out_spec = pl.BlockSpec((tm, Lp), lambda i: (i, 0))
            scratch = []
            kernel = _region_cls_kernel
            dims = ("parallel",)
        else:
            grid = (Mp // tm, H // tk)
            const = lambda i, k: (0, 0)
            in_specs = [
                pl.BlockSpec((tm, tk), lambda i, k: (i, k)),      # x K-slab
                pl.BlockSpec((tk, H), lambda i, k: (k, 0)),       # w1 K-slab (streamed, 2x buf)
                _const_spec((1, H), const, single_buffer),        # b1
                _const_spec((1, H), const, single_buffer),        # gamma
                _const_spec((1, H), const, single_buffer),        # beta
                _const_spec((H, Lp), const, single_buffer),       # w2 (resident)
                _const_spec((1, Lp), const, single_buffer),       # b2
            ]
            out_spec = pl.BlockSpec((tm, Lp), lambda i, k: (i, 0))
            scratch = [pltpu.VMEM((tm, H), jnp.float32)]
            kernel = _region_cls_kernel_ktiled
            dims = ("parallel", "arbitrary")

        return pl.pallas_call(
            kernel,
            out_shape=jax.ShapeDtypeStruct((Mp, Lp), out_dtype),
            grid_spec=pltpu.PrefetchScalarGridSpec(
                num_scalar_prefetch=0,
                grid=grid,
                in_specs=in_specs,
                out_specs=out_spec,
                scratch_shapes=scratch,
            ),
            compiler_params=pltpu.CompilerParams(
                dimension_semantics=dims,
                vmem_limit_bytes=vmem_limit,
            ),
            cost_estimate=cost,
        )(x2d, w1, b1, gamma, beta, w2, b2)

    try:
        out2d = _call(True)
    except Exception:
        # Fallback if pl.Buffered(1) (single-buffered resident weights) is not
        # supported by this JAX build: use default double-buffered specs.
        out2d = _call(False)

    return out2d[:M, :L].reshape(B, S, L)


def init_params(key, hidden_size, label_dim, dtype=jnp.float32):
    k1, k2, k3, k4 = jax.random.split(key, 4)
    scale1 = 1.0 / jnp.sqrt(hidden_size)
    params = {
        # nn.Linear stores weight as (out, in); we keep the (in, out) transpose
        # so the kernel does x @ W directly.
        "w1": jax.random.uniform(k1, (hidden_size, hidden_size),
                                 jnp.float32, -scale1, scale1).astype(dtype),
        "b1": jax.random.uniform(k2, (1, hidden_size),
                                 jnp.float32, -scale1, scale1).astype(dtype),
        "gamma": jnp.ones((1, hidden_size), dtype),   # BertLayerNorm weight
        "beta": jnp.zeros((1, hidden_size), dtype),   # BertLayerNorm bias
        "w2": jax.random.uniform(k3, (hidden_size, label_dim),
                                 jnp.float32, -scale1, scale1).astype(dtype),
        "b2": jax.random.uniform(k4, (1, label_dim),
                                 jnp.float32, -scale1, scale1).astype(dtype),
    }
    return params


def _reference(x, p):
    # Pure-JAX reference (f32 math) matching the PyTorch module.
    xf = x.astype(jnp.float32)
    h = jnp.maximum(xf @ p["w1"].astype(jnp.float32)
                    + p["b1"][0].astype(jnp.float32), 0.0)
    mean = h.mean(-1, keepdims=True)
    var = ((h - mean) ** 2).mean(-1, keepdims=True)
    ln = ((h - mean) / jnp.sqrt(var + 1e-12)
          * p["gamma"][0].astype(jnp.float32) + p["beta"][0].astype(jnp.float32))
    return ln @ p["w2"].astype(jnp.float32) + p["b2"][0].astype(jnp.float32)


if __name__ == "__main__":
    key = jax.random.PRNGKey(0)
    kx, kp, kx2, kp2 = jax.random.split(key, 4)

    batch, seq, label_dim = 2, 8, 16

    # --- Test 1: resident-weight path, exact f32 semantics -------------------
    hidden = 32
    x = jax.random.normal(kx, (batch, seq, hidden), jnp.float32)
    params = init_params(kp, hidden, label_dim)
    out = jax.block_until_ready(region_classification(x, params))
    ref = _reference(x, params)
    assert out.shape == (batch, seq, label_dim)
    assert jnp.allclose(out, ref, atol=1e-4, rtol=1e-4), "mismatch (resident path)"

    # --- Test 2: forced K-tiled path (streamed w1 + f32 accumulator) ---------
    hidden2 = 256
    x2 = jax.random.normal(kx2, (batch, seq, hidden2), jnp.float32)
    params2 = init_params(kp2, hidden2, label_dim)
    out2 = jax.block_until_ready(region_classification(x2, params2, tk=128))
    ref2 = _reference(x2, params2)
    assert out2.shape == (batch, seq, label_dim)
    assert jnp.allclose(out2, ref2, atol=1e-3, rtol=1e-3), "mismatch (k-tiled path)"

    # --- Test 3: bf16 MXU path (weights + streamed activations in bf16) ------
    out3 = jax.block_until_ready(
        region_classification(x, params, matmul_dtype=jnp.bfloat16))
    assert out3.shape == (batch, seq, label_dim)
    assert jnp.allclose(out3, ref, atol=1e-1, rtol=1e-1), "mismatch (bf16 path)"

    print("KERNEL_OK")
</pallas_src>

<mosaic_0001>
module attributes {stable_mosaic.version = 11 : i64} {
  func.func @_region_cls_kernel(%arg0: i32, %arg1: memref<8x32xf32, #tpu.memory_space<vmem>>, %arg2: memref<32x32xf32, #tpu.memory_space<vmem>>, %arg3: memref<1x32xf32, #tpu.memory_space<vmem>>, %arg4: memref<1x32xf32, #tpu.memory_space<vmem>>, %arg5: memref<1x32xf32, #tpu.memory_space<vmem>>, %arg6: memref<32x128xf32, #tpu.memory_space<vmem>>, %arg7: memref<1x128xf32, #tpu.memory_space<vmem>>, %arg8: memref<8x128xf32, #tpu.memory_space<vmem>>) attributes {dimension_semantics = [#tpu.dimension_semantics<parallel>], iteration_bounds = array<i64: 2>, scalar_prefetch = 0 : i64, scratch_operands = 0 : i64, tpu.core_type = #tpu.core_type<tc>, window_params = [{transform_indices = @transform_0, window_bounds = array<i64: 8, 32>}, {pipeline_mode = #tpu.pipeline_mode<synchronous>, transform_indices = @transform_1, window_bounds = array<i64: 32, 32>}, {pipeline_mode = #tpu.pipeline_mode<synchronous>, transform_indices = @transform_2, window_bounds = array<i64: 1, 32>}, {pipeline_mode = #tpu.pipeline_mode<synchronous>, transform_indices = @transform_3, window_bounds = array<i64: 1, 32>}, {pipeline_mode = #tpu.pipeline_mode<synchronous>, transform_indices = @transform_4, window_bounds = array<i64: 1, 32>}, {pipeline_mode = #tpu.pipeline_mode<synchronous>, transform_indices = @transform_5, window_bounds = array<i64: 32, 128>}, {pipeline_mode = #tpu.pipeline_mode<synchronous>, transform_indices = @transform_6, window_bounds = array<i64: 1, 128>}, {transform_indices = @transform_7, window_bounds = array<i64: 8, 128>}]} {
    %c0 = arith.constant 0 : index
    %c0_0 = arith.constant 0 : index
    %0 = vector.load %arg1[%c0, %c0_0] : memref<8x32xf32, #tpu.memory_space<vmem>>, vector<8x32xf32>
    %c0_1 = arith.constant 0 : index
    %c0_2 = arith.constant 0 : index
    %1 = vector.load %arg2[%c0_1, %c0_2] : memref<32x32xf32, #tpu.memory_space<vmem>>, vector<32x32xf32>
    %cst = arith.constant dense<0.000000e+00> : vector<8x32xf32>
    %2 = tpu.matmul %0, %1, %cst {dimension_numbers = #tpu.dot_dimension_numbers<[1], [0], [0], [1], [0, 0, 1, 1], [], []>} : vector<8x32xf32>, vector<32x32xf32>, vector<8x32xf32> -> vector<8x32xf32>
    %c0_3 = arith.constant 0 : index
    %c0_4 = arith.constant 0 : index
    %3 = vector.load %arg3[%c0_3, %c0_4] : memref<1x32xf32, #tpu.memory_space<vmem>>, vector<1x32xf32>
    %4 = vector.broadcast %3 : vector<1x32xf32> to vector<8x32xf32>
    %5 = arith.addf %2, %4 : vector<8x32xf32>
    %cst_5 = arith.constant 0.000000e+00 : f32
    %6 = vector.broadcast %cst_5 : f32 to vector<8x32xf32>
    %7 = arith.maximumf %5, %6 : vector<8x32xf32>
    %cst_6 = arith.constant dense<0.000000e+00> : vector<8xf32>
    %8 = vector.multi_reduction <add>, %7, %cst_6 [1] : vector<8x32xf32> to vector<8xf32>
    %9 = vector.shape_cast %8 : vector<8xf32> to vector<8x1xf32>
    %10 = arith.mulf %7, %7 : vector<8x32xf32>
    %cst_7 = arith.constant dense<0.000000e+00> : vector<8xf32>
    %11 = vector.multi_reduction <add>, %10, %cst_7 [1] : vector<8x32xf32> to vector<8xf32>
    %12 = vector.shape_cast %11 : vector<8xf32> to vector<8x1xf32>
    %cst_8 = arith.constant 3.125000e-02 : f32
    %13 = vector.broadcast %cst_8 : f32 to vector<8x1xf32>
    %14 = arith.mulf %9, %13 : vector<8x1xf32>
    %cst_9 = arith.constant 3.125000e-02 : f32
    %15 = vector.broadcast %cst_9 : f32 to vector<8x1xf32>
    %16 = arith.mulf %12, %15 : vector<8x1xf32>
    %17 = arith.mulf %14, %14 : vector<8x1xf32>
    %18 = arith.subf %16, %17 : vector<8x1xf32>
    %cst_10 = arith.constant 0.000000e+00 : f32
    %19 = vector.broadcast %cst_10 : f32 to vector<8x1xf32>
    %20 = arith.maximumf %18, %19 : vector<8x1xf32>
    %cst_11 = arith.constant 9.99999996E-13 : f32
    %21 = vector.broadcast %cst_11 : f32 to vector<8x1xf32>
    %22 = arith.addf %20, %21 : vector<8x1xf32>
    %23 = math.rsqrt %22 : vector<8x1xf32>
    %24 = vector.broadcast %14 : vector<8x1xf32> to vector<8x32xf32>
    %25 = arith.subf %7, %24 : vector<8x32xf32>
    %26 = vector.broadcast %23 : vector<8x1xf32> to vector<8x32xf32>
    %27 = arith.mulf %25, %26 : vector<8x32xf32>
    %c0_12 = arith.constant 0 : index
    %c0_13 = arith.constant 0 : index
    %28 = vector.load %arg4[%c0_12, %c0_13] : memref<1x32xf32, #tpu.memory_space<vmem>>, vector<1x32xf32>
    %29 = vector.broadcast %28 : vector<1x32xf32> to vector<8x32xf32>
    %30 = arith.mulf %27, %29 : vector<8x32xf32>
    %c0_14 = arith.constant 0 : index
    %c0_15 = arith.constant 0 : index
    %31 = vector.load %arg5[%c0_14, %c0_15] : memref<1x32xf32, #tpu.memory_space<vmem>>, vector<1x32xf32>
    %32 = vector.broadcast %31 : vector<1x32xf32> to vector<8x32xf32>
    %33 = arith.addf %30, %32 : vector<8x32xf32>
    %c0_16 = arith.constant 0 : index
    %c0_17 = arith.constant 0 : index
    %34 = vector.load %arg6[%c0_16, %c0_17] : memref<32x128xf32, #tpu.memory_space<vmem>>, vector<32x128xf32>
    %cst_18 = arith.constant dense<0.000000e+00> : vector<8x128xf32>
    %35 = tpu.matmul %33, %34, %cst_18 {dimension_numbers = #tpu.dot_dimension_numbers<[1], [0], [0], [1], [0, 0, 1, 1], [], []>} : vector<8x32xf32>, vector<32x128xf32>, vector<8x128xf32> -> vector<8x128xf32>
    %c0_19 = arith.constant 0 : index
    %c0_20 = arith.constant 0 : index
    %36 = vector.load %arg7[%c0_19, %c0_20] : memref<1x128xf32, #tpu.memory_space<vmem>>, vector<1x128xf32>
    %37 = vector.broadcast %36 : vector<1x128xf32> to vector<8x128xf32>
    %38 = arith.addf %35, %37 : vector<8x128xf32>
    %c0_21 = arith.constant 0 : index
    %c0_22 = arith.constant 0 : index
    %39 = vector.load %arg8[%c0_21, %c0_22] : memref<8x128xf32, #tpu.memory_space<vmem>>, vector<8x128xf32>
    tpu.vector_store %arg8[%c0_21, %c0_22], %38 {strides = array<i32>} : memref<8x128xf32, #tpu.memory_space<vmem>>, vector<8x128xf32>,
    return
  }
  func.func @transform_0(%arg0: i32) -> (i32, i32) {
    %c0_i32 = arith.constant 0 : i32
    %c0_i32_0 = arith.constant 0 : i32
    return %arg0, %c0_i32 : i32, i32
  }
  func.func @transform_1(%arg0: i32) -> (i32, i32) {
    %c0_i32 = arith.constant 0 : i32
    %c0_i32_0 = arith.constant 0 : i32
    %c0_i32_1 = arith.constant 0 : i32
    return %c0_i32, %c0_i32_0 : i32, i32
  }
  func.func @transform_2(%arg0: i32) -> (i32, i32) {
    %c0_i32 = arith.constant 0 : i32
    %c0_i32_0 = arith.constant 0 : i32
    %c0_i32_1 = arith.constant 0 : i32
    return %c0_i32, %c0_i32_0 : i32, i32
  }
  func.func @transform_3(%arg0: i32) -> (i32, i32) {
    %c0_i32 = arith.constant 0 : i32
    %c0_i32_0 = arith.constant 0 : i32
    %c0_i32_1 = arith.constant 0 : i32
    return %c0_i32, %c0_i32_0 : i32, i32
  }
  func.func @transform_4(%arg0: i32) -> (i32, i32) {
    %c0_i32 = arith.constant 0 : i32
    %c0_i32_0 = arith.constant 0 : i32
    %c0_i32_1 = arith.constant 0 : i32
    return %c0_i32, %c0_i32_0 : i32, i32
  }
  func.func @transform_5(%arg0: i32) -> (i32, i32) {
    %c0_i32 = arith.constant 0 : i32
    %c0_i32_0 = arith.constant 0 : i32
    %c0_i32_1 = arith.constant 0 : i32
    return %c0_i32, %c0_i32_0 : i32, i32
  }
  func.func @transform_6(%arg0: i32) -> (i32, i32) {
    %c0_i32 = arith.constant 0 : i32
    %c0_i32_0 = arith.constant 0 : i32
    %c0_i32_1 = arith.constant 0 : i32
    return %c0_i32, %c0_i32_0 : i32, i32
  }
  func.func @transform_7(%arg0: i32) -> (i32, i32) {
    %c0_i32 = arith.constant 0 : i32
    %c0_i32_0 = arith.constant 0 : i32
    return %arg0, %c0_i32 : i32, i32
  }
}

module attributes {stable_mosaic.version = 11 : i64} {
  func.func @_region_cls_kernel(%arg0: i32, %arg1: memref<8x32xf32, #tpu.memory_space<vmem>>, %arg2: memref<32x32xf32, #tpu.memory_space<vmem>>, %arg3: memref<1x32xf32, #tpu.memory_space<vmem>>, %arg4: memref<1x32xf32, #tpu.memory_space<vmem>>, %arg5: memref<1x32xf32, #tpu.memory_space<vmem>>, %arg6: memref<32x128xf32, #tpu.memory_space<vmem>>, %arg7: memref<1x128xf32, #tpu.memory_space<vmem>>, %arg8: memref<8x128xf32, #tpu.memory_space<vmem>>) attributes {dimension_semantics = [#tpu.dimension_semantics<parallel>], iteration_bounds = array<i64: 2>, scalar_prefetch = 0 : i64, scratch_operands = 0 : i64, tpu.core_type = #tpu.core_type<tc>, window_params = [{transform_indices = @transform_0, window_bounds = array<i64: 8, 32>}, {pipeline_mode = #tpu.pipeline_mode<synchronous>, transform_indices = @transform_1, window_bounds = array<i64: 32, 32>}, {pipeline_mode = #tpu.pipeline_mode<synchronous>, transform_indices = @transform_2, window_bounds = array<i64: 1, 32>}, {pipeline_mode = #tpu.pipeline_mode<synchronous>, transform_indices = @transform_3, window_bounds = array<i64: 1, 32>}, {pipeline_mode = #tpu.pipeline_mode<synchronous>, transform_indices = @transform_4, window_bounds = array<i64: 1, 32>}, {pipeline_mode = #tpu.pipeline_mode<synchronous>, transform_indices = @transform_5, window_bounds = array<i64: 32, 128>}, {pipeline_mode = #tpu.pipeline_mode<synchronous>, transform_indices = @transform_6, window_bounds = array<i64: 1, 128>}, {transform_indices = @transform_7, window_bounds = array<i64: 8, 128>}]} {
    %c0 = arith.constant 0 : index
    %c0_0 = arith.constant 0 : index
    %0 = vector.load %arg1[%c0, %c0_0] : memref<8x32xf32, #tpu.memory_space<vmem>>, vector<8x32xf32>
    %c0_1 = arith.constant 0 : index
    %c0_2 = arith.constant 0 : index
    %1 = vector.load %arg2[%c0_1, %c0_2] : memref<32x32xf32, #tpu.memory_space<vmem>>, vector<32x32xf32>
    %cst = arith.constant dense<0.000000e+00> : vector<8x32xf32>
    %2 = tpu.matmul %0, %1, %cst {dimension_numbers = #tpu.dot_dimension_numbers<[1], [0], [0], [1], [0, 0, 1, 1], [], []>} : vector<8x32xf32>, vector<32x32xf32>, vector<8x32xf32> -> vector<8x32xf32>
    %c0_3 = arith.constant 0 : index
    %c0_4 = arith.constant 0 : index
    %3 = vector.load %arg3[%c0_3, %c0_4] : memref<1x32xf32, #tpu.memory_space<vmem>>, vector<1x32xf32>
    %4 = vector.broadcast %3 : vector<1x32xf32> to vector<8x32xf32>
    %5 = arith.addf %2, %4 : vector<8x32xf32>
    %cst_5 = arith.constant 0.000000e+00 : f32
    %6 = vector.broadcast %cst_5 : f32 to vector<8x32xf32>
    %7 = arith.maximumf %5, %6 : vector<8x32xf32>
    %cst_6 = arith.constant dense<0.000000e+00> : vector<8xf32>
    %8 = vector.multi_reduction <add>, %7, %cst_6 [1] : vector<8x32xf32> to vector<8xf32>
    %9 = vector.shape_cast %8 : vector<8xf32> to vector<8x1xf32>
    %10 = arith.mulf %7, %7 : vector<8x32xf32>
    %cst_7 = arith.constant dense<0.000000e+00> : vector<8xf32>
    %11 = vector.multi_reduction <add>, %10, %cst_7 [1] : vector<8x32xf32> to vector<8xf32>
    %12 = vector.shape_cast %11 : vector<8xf32> to vector<8x1xf32>
    %cst_8 = arith.constant 3.125000e-02 : f32
    %13 = vector.broadcast %cst_8 : f32 to vector<8x1xf32>
    %14 = arith.mulf %9, %13 : vector<8x1xf32>
    %cst_9 = arith.constant 3.125000e-02 : f32
    %15 = vector.broadcast %cst_9 : f32 to vector<8x1xf32>
    %16 = arith.mulf %12, %15 : vector<8x1xf32>
    %17 = arith.mulf %14, %14 : vector<8x1xf32>
    %18 = arith.subf %16, %17 : vector<8x1xf32>
    %cst_10 = arith.constant 0.000000e+00 : f32
    %19 = vector.broadcast %cst_10 : f32 to vector<8x1xf32>
    %20 = arith.maximumf %18, %19 : vector<8x1xf32>
    %cst_11 = arith.constant 9.99999996E-13 : f32
    %21 = vector.broadcast %cst_11 : f32 to vector<8x1xf32>
    %22 = arith.addf %20, %21 : vector<8x1xf32>
    %23 = math.rsqrt %22 : vector<8x1xf32>
    %24 = vector.broadcast %14 : vector<8x1xf32> to vector<8x32xf32>
    %25 = arith.subf %7, %24 : vector<8x32xf32>
    %26 = vector.broadcast %23 : vector<8x1xf32> to vector<8x32xf32>
    %27 = arith.mulf %25, %26 : vector<8x32xf32>
    %c0_12 = arith.constant 0 : index
    %c0_13 = arith.constant 0 : index
    %28 = vector.load %arg4[%c0_12, %c0_13] : memref<1x32xf32, #tpu.memory_space<vmem>>, vector<1x32xf32>
    %29 = vector.broadcast %28 : vector<1x32xf32> to vector<8x32xf32>
    %30 = arith.mulf %27, %29 : vector<8x32xf32>
    %c0_14 = arith.constant 0 : index
    %c0_15 = arith.constant 0 : index
    %31 = vector.load %arg5[%c0_14, %c0_15] : memref<1x32xf32, #tpu.memory_space<vmem>>, vector<1x32xf32>
    %32 = vector.broadcast %31 : vector<1x32xf32> to vector<8x32xf32>
    %33 = arith.addf %30, %32 : vector<8x32xf32>
    %c0_16 = arith.constant 0 : index
    %c0_17 = arith.constant 0 : index
    %34 = vector.load %arg6[%c0_16, %c0_17] : memref<32x128xf32, #tpu.memory_space<vmem>>, vector<32x128xf32>
    %cst_18 = arith.constant dense<0.000000e+00> : vector<8x128xf32>
    %35 = tpu.matmul %33, %34, %cst_18 {dimension_numbers = #tpu.dot_dimension_numbers<[1], [0], [0], [1], [0, 0, 1, 1], [], []>} : vector<8x32xf32>, vector<32x128xf32>, vector<8x128xf32> -> vector<8x128xf32>
    %c0_19 = arith.constant 0 : index
    %c0_20 = arith.constant 0 : index
    %36 = vector.load %arg7[%c0_19, %c0_20] : memref<1x128xf32, #tpu.memory_space<vmem>>, vector<1x128xf32>
    %37 = vector.broadcast %36 : vector<1x128xf32> to vector<8x128xf32>
    %38 = arith.addf %35, %37 : vector<8x128xf32>
    %c0_21 = arith.constant 0 : index
    %c0_22 = arith.constant 0 : index
    %39 = vector.load %arg8[%c0_21, %c0_22] : memref<8x128xf32, #tpu.memory_space<vmem>>, vector<8x128xf32>
    tpu.vector_store %arg8[%c0_21, %c0_22], %38 {strides = array<i32>} : memref<8x128xf32, #tpu.memory_space<vmem>>, vector<8x128xf32>,
    return
  }
  func.func @transform_0(%arg0: i32) -> (i32, i32) {
    %c0_i32 = arith.constant 0 : i32
    %c0_i32_0 = arith.constant 0 : i32
    return %arg0, %c0_i32 : i32, i32
  }
  func.func @transform_1(%arg0: i32) -> (i32, i32) {
    %c0_i32 = arith.constant 0 : i32
    %c0_i32_0 = arith.constant 0 : i32
    %c0_i32_1 = arith.constant 0 : i32
    return %c0_i32, %c0_i32_0 : i32, i32
  }
  func.func @transform_2(%arg0: i32) -> (i32, i32) {
    %c0_i32 = arith.constant 0 : i32
    %c0_i32_0 = arith.constant 0 : i32
    %c0_i32_1 = arith.constant 0 : i32
    return %c0_i32, %c0_i32_0 : i32, i32
  }
  func.func @transform_3(%arg0: i32) -> (i32, i32) {
    %c0_i32 = arith.constant 0 : i32
    %c0_i32_0 = arith.constant 0 : i32
    %c0_i32_1 = arith.constant 0 : i32
    return %c0_i32, %c0_i32_0 : i32, i32
  }
  func.func @transform_4(%arg0: i32) -> (i32, i32) {
    %c0_i32 = arith.constant 0 : i32
    %c0_i32_0 = arith.constant 0 : i32
    %c0_i32_1 = arith.constant 0 : i32
    return %c0_i32, %c0_i32_0 : i32, i32
  }
  func.func @transform_5(%arg0: i32) -> (i32, i32) {
    %c0_i32 = arith.constant 0 : i32
    %c0_i32_0 = arith.constant 0 : i32
    %c0_i32_1 = arith.constant 0 : i32
    return %c0_i32, %c0_i32_0 : i32, i32
  }
  func.func @transform_6(%arg0: i32) -> (i32, i32) {
    %c0_i32 = arith.constant 0 : i32
    %c0_i32_0 = arith.constant 0 : i32
    %c0_i32_1 = arith.constant 0 : i32
    return %c0_i32, %c0_i32_0 : i32, i32
  }
  func.func @transform_7(%arg0: i32) -> (i32, i32) {
    %c0_i32 = arith.constant 0 : i32
    %c0_i32_0 = arith.constant 0 : i32
    return %arg0, %c0_i32 : i32, i32
  }
}

</mosaic_0001>

<bundles_post_ra>
// kernel: tpu_custom_call.1
= control target key start
LH: loop header
LB: loop body
LE: loop exit
PB: predicated region body
PF: predicated region fallthrough
CT: control target
= control target key end

     0   :  { %12 = vsyncpa [#allocation3], 0  ;;  %s1226_s0 = inlined_call_operand.hbm [shape: f32[16,32], index: 0, kind: input, shape index: {}]   ;;  %s1227_s1 = inlined_call_operand.hbm [shape: f32[32,32], index: 1, kind: input, shape index: {}]   ;;  %s1228_s2 = inlined_call_operand.vmem [shape: f32[1,32], index: 2, kind: input, shape index: {}]   ;;  %s1229_s3 = inlined_call_operand.vmem [shape: f32[1,32], index: 3, kind: input, shape index: {}]   ;;  %s1230_s4 = inlined_call_operand.vmem [shape: f32[1,32], index: 4, kind: input, shape index: {}]   ;;  %s1231_s5 = inlined_call_operand.hbm [shape: f32[32,128], index: 5, kind: input, shape index: {}]   ;;  %s1232_s6 = inlined_call_operand.vmem [shape: f32[1,128], index: 6, kind: input, shape index: {}]   ;;  %s1233_s7 = inlined_call_operand.hbm [shape: f32[16,128], index: 7, kind: output, shape index: {}]  }
   0x1   :  { %14 = vsyncpa [#allocation3 + $0x1], 0 }
   0x2   :  { %15 = vsyncpa [#allocation6], 0 }
   0x3   :  { %16 = vsyncpa [#allocation4], 0 }
   0x4   :  { %18 = vsyncpa [#allocation4 + $0x1], 0  ;;  %s977_s24 = smov 0   ;;  %s979_s25 = smov 0  }
   0x5   :  { %s981_s26 = smov 0   ;;  %s983_s27 = smov 0  }
   0x6 LB: > { %s998_s28 = sadd.s32 4294967295, %s926_s27   ;;  %s630_s29 = sadd.s32 4294967294, %s926_s27   ;;  %s926_s27 = sphi %s983_s27, %s1253_s27   ;;  %s922_s26 = sphi %s981_s26, %s1252_s26   ;;  %s918_s25 = sphi %s979_s25, %s1251_s25   ;;  %s914_s24 = sphi %s977_s24, %s1250_s24  }
   0x7   : > { %p44_p0 = scmp.ne.s32.totalorder %s918_s25, %s914_s24  ;;  %p1234_p1 = scmp.eq.s32.totalorder %s998_s28, 0 }
   0x8   : > { %p200_p3 = scmp.eq.s32.totalorder %s630_s29, 1  ;;  %p631_p5 = scmp.ge.s32.totalorder %s926_s27, 1 }
   0x9   : > { %p1007_p4 = por %p1234_p1, %p44_p0  ;;  %p207_p7 = scmp.lt.s32.totalorder %s926_s27, 3 }
   0xa   : > { %p1012_p6 = por %p200_p3, %p44_p0  ;;  %s928_s10 = smov [#allocation5]  }
   0xb   : > { %s1237_s30 = scalar_select %p1007_p4, 1, 0 }
   0xc   : > { %s1238_s8 = scalar_select %p1012_p6, 1, 0 }
   0xd   : > { %p1017_p8 = pnand %p631_p5, %p207_p7  ;;  %s219_s11 = sshll.u32 %s928_s10, 4  ;;  %s1021_s11 = int_to_ptr.vmem [resolvable:$true] %s219_s11 }
   0xe   : > { %s929_s13 = smov [#allocation7]   ;;  %s770_s17 = scalar_lea.hbm %s1227_s1, 512 }
   0xf   : > { %p708_p9 = pneg %p1017_p8  ;;  %s241_s14 = sshll.u32 %s929_s13, 4  ;;  %s1032_s14 = int_to_ptr.vmem [resolvable:$true] %s241_s14 }
  0x10   : > { %p771_p12 = scmp.ne.s32.totalorder %s1227_s1, %s770_s17  ;;  %p777_p5 = scmp.lt.u32.totalorder %s770_s17, %s1227_s1 }
  0x11   : > { %p1028_p11 = pnand %p708_p9, %p1234_p1 }
  0x13   : > { %p772_p13 = pneg %p1028_p11 }
  0x15   : > { %p773_p0 = pnand %p772_p13, %p771_p12 }
  0x17   : > { %p774_p3 = pneg %p773_p0 }
  0x19   : > { %p779_p7 = pnand %p777_p5, %p774_p3 }
  0x1b   : > { %782 = shalt.err (!%p779_p7)
}
  0x1c   : > { %s783_s22 = scalar_lea.vmem %s1021_s11, 512  ;;  %p791_p2 = scmp.lt.s32.totalorder %s1021_s11, %s1021_s11 }
  0x1d   : > { %p784_p9 = scmp.ne.s32.totalorder %s1021_s11, %s783_s22  ;;  %p792_p12 = scmp.lt.s32.totalorder %s783_s22, %s783_s22 }
  0x1f   : > { %p786_p10 = pnand %p784_p9, %p772_p13  ;;  %p793_p0 = por %p792_p12, %p791_p2 }
  0x21   : > { %p787_p1 = pneg %p786_p10 }
  0x23   : > { %p794_p6 = pnand %p793_p0, %p787_p1 }
  0x25   : > { %797 = shalt.err (!%p794_p6)
}
  0x26   : > { %s930_s23 = smov 128   ;;  %s931_s29 = smov 8  }
  0x27   : > { %711 = dma.hbm_to_vmem [thread:$0]  (!%p1028_p11), %s1227_s1, 512, %s1021_s11, [#allocation6], %s930_s23, %s930_s23, %s931_s29  }
  0x28   : > { %s798_s17 = scalar_lea.hbm %s1231_s5, 512 }
  0x29   : > { %p799_p2 = scmp.ne.s32.totalorder %s1231_s5, %s798_s17  ;;  %p805_p10 = scmp.lt.u32.totalorder %s798_s17, %s1231_s5 }
  0x2b   : > { %p801_p1 = pnand %p799_p2, %p772_p13 }
  0x2d   : > { %p802_p6 = pneg %p801_p1 }
  0x2f   : > { %p807_p3 = pnand %p805_p10, %p802_p6 }
  0x31   : > { %810 = shalt.err (!%p807_p3)
}
  0x32   : > { %s811_s11 = scalar_lea.vmem %s1032_s14, 512  ;;  %p819_p12 = scmp.lt.s32.totalorder %s1032_s14, %s1032_s14 }
  0x33   : > { %p812_p5 = scmp.ne.s32.totalorder %s1032_s14, %s811_s11  ;;  %p820_p0 = scmp.lt.s32.totalorder %s811_s11, %s811_s11 }
  0x35   : > { %p814_p7 = pnand %p812_p5, %p772_p13  ;;  %p821_p2 = por %p820_p0, %p819_p12 }
  0x37   : > { %p815_p9 = pneg %p814_p7 }
  0x39   : > { %p822_p1 = pnand %p821_p2, %p815_p9 }
  0x3b   : > { %825 = shalt.err (!%p822_p1)
}
  0x3c   : > { %714 = dma.hbm_to_vmem [thread:$0]  (!%p1028_p11), %s1231_s5, 512, %s1032_s14, [#allocation6], %s930_s23, %s930_s23, %s931_s29  }
  0x3d   : > { %s1087_s13 = sadd.s32 1, %s926_s27   ;;  %s31_s12 = sadd.s32 1, %s922_s26 }
  0x3e   : > { %s28_s15 = ssub.s32 %s926_s27, %s1087_s13  ;;  %p38_p13 = scmp.ne.s32.totalorder %s922_s26, %s918_s25 }
  0x3f   : > { %p29_p6 = scmp.eq.s32.totalorder %s28_s15, 0  ;;  %p39_p10 = scmp.eq.s32.totalorder %s926_s27, 0 }
  0x40   : > { %p1241_p3 = scmp.eq.s32.totalorder %s998_s28, 1  ;;  %p725_p7 = scmp.lt.s32.totalorder %s926_s27, 2 }
  0x41   : > { %s1103_s17 = scalar_select %p29_p6, %s922_s26, %s31_s12  }
  0x42   : > { %p1097_p5 = por %p1241_p3, %p38_p13  ;;  %p40_p9 = por %p39_p10, %p38_p13 }
  0x43   : > { %s258_s18 = sand.u32 1, %s922_s26   ;;  %s636_s14 = sshll.u32 %s926_s27, 7 }
  0x44   : > { %s1242_s16 = scalar_select %p1097_p5, 1, 0 }
  0x45   : > { %s635_s19 = sshll.u32 %s258_s18, 3  ;;  %s1110_s20 = scalar_lea.hbm %s1226_s0, %s636_s14 }
  0x46   : > { %s262_s21 = scalar_lea.vmem [#allocation2], %s635_s19  ;;  %p1114_p11 = pnand %p725_p7, %p40_p9 }
  0x47   : > { %s269_s11 = sshll.u32 %s262_s21, 4  ;;  %s259_s10 = scalar_lea.sflag [#allocation3], %s258_s18  ;;  %s1112_s11 = int_to_ptr.vmem [resolvable:$true] %s269_s11 }
  0x48   : > { %s826_s12 = scalar_lea.hbm %s1110_s20, 128  ;;  %p828_p0 = pneg %p1114_p11 }
  0x49   : > { %p827_p12 = scmp.ne.s32.totalorder %s1110_s20, %s826_s12  ;;  %s831_s14 = scalar_lea.hbm %s1226_s0, 256 }
  0x4a   : > { %p832_p13 = scmp.lt.u32.totalorder %s1110_s20, %s1226_s0  ;;  %p833_p6 = scmp.lt.u32.totalorder %s831_s14, %s826_s12 }
  0x4b   : > { %p829_p2 = pnand %p828_p0, %p827_p12  ;;  %p835_p3 = scmp.lt.u32.totalorder %s826_s12, %s1110_s20 }
  0x4c   : > { %p834_p10 = por %p833_p6, %p832_p13 }
  0x4d   : > { %p830_p1 = pneg %p829_p2 }
  0x4e   : > { %p836_p7 = por %p835_p3, %p834_p10 }
  0x50   : > { %p837_p9 = pnand %p836_p7, %p830_p1 }
  0x52   : > { %840 = shalt.err (!%p837_p9)
}
  0x53   : > { %s841_s18 = scalar_lea.vmem %s1112_s11, 128  ;;  %s932_s21 = smov [#allocation2]  }
  0x54   : > { %p842_p12 = scmp.ne.s32.totalorder %s1112_s11, %s841_s18  ;;  %s846_s15 = sshll.u32 %s932_s21, 4  ;;  %s847_s15 = int_to_ptr.vmem [resolvable:$false] %s846_s15 }
  0x55   : > { %s848_s19 = scalar_lea.vmem %s847_s15, 256  ;;  %p849_p4 = scmp.lt.s32.totalorder %s1112_s11, %s847_s15 }
  0x56   : > { %p844_p2 = pnand %p842_p12, %p828_p0  ;;  %p850_p13 = scmp.lt.s32.totalorder %s848_s19, %s841_s18 }
  0x58   : > { %p845_p5 = pneg %p844_p2  ;;  %p851_p6 = por %p850_p13, %p849_p4 }
  0x5a   : > { %p852_p10 = pnand %p851_p6, %p845_p5 }
  0x5c   : > { %855 = shalt.err (!%p852_p10)
}
  0x5d   : > { %718 = dma.hbm_to_vmem [thread:$0]  (!%p1114_p11), %s1110_s20, 128, %s1112_s11, %s259_s10  }
  0x5e   : > { %278 = sbr.rel (%p1017_p8) target bundleno = 731 (0x2db), region = 48  ;;  %s1146_s12 = sand.u32 (!%p1017_p8), 1, %s918_s25  }
  0x5f   : > { %s638_s14 = sshll.u32 (!%p1017_p8), %s1146_s12, 3  ;;  %s281_s23 = scalar_lea.sflag (!%p1017_p8), [#allocation3], %s1146_s12 }
  0x60   : > { %s284_s29 = scalar_lea.vmem (!%p1017_p8), [#allocation2], %s638_s14  ;;  %p1244_p4 = scmp.ne.s32.totalorder (!%p1017_p8), %s1237_s30, 0 }
  0x65   : > { %901 = dma.done.wait (%p1244_p4), %s281_s23, 128  }
  0x66   : > { %903 = vsyncadd (%p1244_p4), %s281_s23, 4294967168  ;;  %p1245_p5 = scmp.eq.s32.totalorder %s998_s28, 0 }
  0x68   : > { %905 = dma.done.wait (%p1245_p5), [#allocation6], 1024   ;;  %p1246_p8 = pmov %p1245_p5 }
  0x69   : > { %v933_v0 = vmov 0.0|0.0   ;;  %vm934_vm0 = vmmov 0   ;;  %v935_v1 = vmov 0.0   ;;  %v324_v2 = vld [vmem:[#allocation5] sm:$0xff]  ;;  %v325_v3 = vld [vmem:[#allocation5 + $0x8] sm:$0xff]  ;;  %v326_v4 = vld [vmem:[#allocation5 + $0x10] sm:$0xff] }
  0x6a   : > { %907 = vsyncadd (%p1246_p8), [#allocation6], 4294966272  ;;  %684 = vmatprep.subr.bf16.mxu0 %v933_v0  ;;  %670 = vmatprep.mubr.msk.f32.mxu0 %vm934_vm0, %v935_v1  ;;  %v685_v5 = vpack.c.bf16 %v325_v3, %v324_v2  ;;  %v327_v6 = vld [vmem:[#allocation5 + $0x18] sm:$0xff]  ;;  %vm335_vm1 = vcmask 261120   ;;  %v642_v9 = vld [vmem:[%s1228_s2] ss:$0 sm:$0xff] }
  0x6b   : > { %690 = vmatprep.subr.bf16.mxu1 %v933_v0  ;;  %681 = vmatprep.mubr.msk.f32.mxu1 %vm934_vm0, %v935_v1  ;;  %v688_v7 = vpack.c.bf16 %v327_v6, %v326_v4  ;;  %v323_v8 = vld [vmem:[%s284_s29] sm:$0xff]  ;;  %v442_v17 = vld [vmem:[#allocation7] sm:$0xff]  ;;  %v443_v18 = vld [vmem:[#allocation7 + $0x8] sm:$0xff]  ;;  %s649_s15 = sshll.u32 %s998_s28, 7  ;;  %s322_s19 = scalar_lea.vmem [#allocation8], %s638_s14 }
  0x6c   : > { %686 = vmatpush3.bf16.msra.mxu0 %v685_v5  ;;  %v444_v19 = vld [vmem:[#allocation7 + $0x10] sm:$0xff]  ;;  %v691_v20 = vpack.c.bf16 %v443_v18, %v442_v17  ;;  %v445_v21 = vld [vmem:[#allocation7 + $0x18] sm:$0xff]  ;;  %s541_s23 = sshll.u32 %s322_s19, 4  ;;  %s1182_s9 = scalar_lea.hbm %s1233_s7, %s649_s15  ;;  %s1184_s23 = int_to_ptr.vmem [resolvable:$true] %s541_s23 }
  0x6d   : > { %687 = vmatprep.subr.bf16.mxu0 %v933_v0  ;;  %v694_v22 = vpack.c.bf16 %v445_v21, %v444_v19  ;;  %v644_v33 = vld [vmem:[%s1229_s3] ss:$0 sm:$0xff]  ;;  %s528_s20 = scalar_lea.sflag [#allocation4], %s1146_s12  ;;  %s856_s11 = scalar_lea.vmem %s1184_s23, 128 }
  0x6e   : > { %692 = vmatpush3.bf16.msra.mxu1 %v691_v20  ;;  %v645_v35 = vld [vmem:[%s1230_s4] ss:$0 sm:$0xff]  ;;  %p857_p11 = scmp.ne.s32.totalorder %s1184_s23, %s856_s11  ;;  %p1247_p0 = scmp.ne.s32.totalorder %s1242_s16, 0 }
  0x6f   : > { %693 = vmatprep.subr.bf16.mxu1 %v933_v0  ;;  %v646_v38 = vld [vmem:[%s1232_s6] ss:$0 sm:$0xff]  ;;  %s936_s28 = smov [#allocation8]  }
  0x70   : > { %689 = vmatpush3.bf16.msra.mxu0 %v688_v7  ;;  %p858_p1 = pnand %p857_p11, %p1247_p0  ;;  %s860_s14 = sshll.u32 %s936_s28, 4  ;;  %s861_s14 = int_to_ptr.vmem [resolvable:$false] %s860_s14 }
  0x71   : > { %s862_s22 = scalar_lea.vmem %s861_s14, 256  ;;  %p863_p7 = scmp.lt.s32.totalorder %s1184_s23, %s861_s14 }
  0x72   : > { %695 = vmatpush3.bf16.msra.mxu1 %v694_v22  ;;  %p859_p3 = pneg %p858_p1  ;;  %p864_p9 = scmp.lt.s32.totalorder %s862_s22, %s856_s11 }
  0x73   : > { %671 = vmatmul.mubr.msk.f32.vlgmr.msra.gmra.mrb[0].mxu0 %vm335_vm1, %v323_v8 }
  0x74   : > { %p865_p12 = por %p864_p9, %p863_p7 }
  0x76   : > { %p866_p2 = pnand %p865_p12, %p859_p3 }
 0x146   : > { %v405_v10 = vpop.f32.mrb[0].mxu0 }
 0x147   : > { %v406_v11 = vadd.f32 %v642_v9, %v405_v10  ;;  %v672_v12 = vpop.f32.mrb[1].mxu0 }
 0x149   : > { %v409_v13 = vmax.f32 %v406_v11, 0.0 }
 0x14b   : > { %v410_v14 = vsel %vm335_vm1, %v409_v13, 0.0  ;;  %v413_v15 = vmul.f32 %v409_v13, %v409_v13 }
 0x14c   : > { %411 = vadd.xlane.f32.xlu0 %v410_v14 }
 0x14d   : > { %v414_v16 = vsel %vm335_vm1, %v413_v15, 0.0 }
 0x150   : > { %415 = vadd.xlane.f32.xlu0 %v414_v16 }
 0x1d9   : > { %v412_v23 = vpop.xlane.xlu0 %411 }
 0x1da   : > { %v417_v24 = vmul.f32 0.03125, %v412_v23 }
 0x1dc   : > { %v419_v26 = vmul.f32 %v417_v24, %v417_v24  ;;  %v424_v31 = vsub.f32 %v409_v13, %v417_v24 }
 0x1dd   : > { %v416_v25 = vpop.xlane.xlu0 %415 }
 0x1de   : > { %v418_v27 = vmul.f32 0.03125, %v416_v25 }
 0x1e0   : > { %v420_v28 = vsub.f32 %v418_v27, %v419_v26 }
 0x1e2   : > { %v421_v29 = vmax.f32 %v420_v28, 0.0 }
 0x1e4   : > { %v422_v30 = vadd.f32 1e-12, %v421_v29 }
 0x1e6   : > { %768 = vrsqrt.f32 %v422_v30 }
 0x1f0   : > { %v769_v32 = vpop.eup %768 }
 0x1f1   : > { %v425_v34 = vmul.f32 %v769_v32, %v424_v31 }
 0x1f3   : > { %v433_v36 = vmul.f32 %v644_v33, %v425_v34 }
 0x1f5   : > { %v441_v37 = vadd.f32 %v645_v35, %v433_v36 }
 0x1f7   : > { %682 = vmatmul.mubr.msk.f32.vlgmr.msra.gmra.mrb[0].mxu1 %vm335_vm1, %v441_v37 }
 0x2ca   : > { %v522_v39 = vpop.f32.mrb[0].mxu1 }
 0x2cb   : > { %v523_v40 = vadd.f32 %v646_v38, %v522_v39  ;;  %v683_v41 = vpop.f32.mrb[1].mxu1 }
 0x2cd   : > { %526 = vst [vmem:[%s322_s19] sm:$0xff] %v523_v40 }
 0x2ce   : > { %869 = shalt.err (!%p866_p2)
}
 0x2cf   : > { %s870_s12 = scalar_lea.hbm %s1182_s9, 128  ;;  %s874_s21 = scalar_lea.hbm %s1233_s7, 256 }
 0x2d0   : > { %p871_p13 = scmp.ne.s32.totalorder %s1182_s9, %s870_s12  ;;  %p875_p4 = scmp.lt.u32.totalorder %s1182_s9, %s1233_s7 }
 0x2d1   : > { %p876_p5 = scmp.lt.u32.totalorder %s874_s21, %s870_s12  ;;  %p878_p11 = scmp.lt.u32.totalorder %s870_s12, %s1182_s9 }
 0x2d2   : > { %p872_p6 = pnand %p871_p13, %p1247_p0 }
 0x2d3   : > { %p877_p8 = por %p876_p5, %p875_p4 }
 0x2d4   : > { %p873_p10 = pneg %p872_p6 }
 0x2d5   : > { %p879_p1 = por %p878_p11, %p877_p8 }
 0x2d7   : > { %p880_p3 = pnand %p879_p1, %p873_p10 }
 0x2d9   : > { %883 = shalt.err (!%p880_p3)
}
 0x2da   : > { %706 = dma.vmem_to_hbm [thread:$0]  (%p1247_p0), %s1184_s23, 128, %s1182_s9, %s528_s20  }
 0x2db PF: > { %s553_s29 = sand.u32 1, %s914_s24   ;;  %p1248_p7 = scmp.ne.s32.totalorder %s1238_s8, 0 }
 0x2dc   : > { %p1249_p9 = scmp.ge.s32.totalorder %s926_s27, 2  ;;  %s554_s30 = scalar_lea.sflag [#allocation4], %s553_s29 }
 0x2de   : > { %p720_p12 = pnand %p1249_p9, %p1248_p7 }
 0x2e0   : > { %909 = dma.done.wait (!%p720_p12), %s554_s30, 128  }
 0x2e1   : > { %911 = vsyncadd (!%p720_p12), %s554_s30, 4294967168  ;;  %p21_p2 = scmp.ge.s32.totalorder %s1087_s13, 4   ;;  %s1250_s24 = smov %s918_s25 }
 0x2e2   : > { %s1251_s25 = smov %s922_s26  ;;  %s1252_s26 = smov %s1103_s17 }
 0x2e3   : > { %s1253_s27 = smov %s1087_s13  ;;  %23 = sbr.rel (!%p21_p2) target bundleno = 6 (0x6), region = 101 }
 0x2ea   :  { %559 = vsyncpa [#allocation3], 1 }
 0x2eb   :  { %561 = vsyncpa [#allocation3 + $0x1], 1 }
 0x2ec   :  { %562 = vsyncpa [#allocation6], 1 }
 0x2ed   :  { %563 = vsyncpa [#allocation4], 1 }
 0x2ee   :  { %565 = vsyncpa [#allocation4 + $0x1], 1 }

// kernel: tpu_custom_call.1
= control target key start
LH: loop header
LB: loop body
LE: loop exit
PB: predicated region body
PF: predicated region fallthrough
CT: control target
= control target key end

     0   :  { %12 = vsyncpa [#allocation3], 0  ;;  %s1226_s0 = inlined_call_operand.hbm [shape: f32[16,32], index: 0, kind: input, shape index: {}]   ;;  %s1227_s1 = inlined_call_operand.hbm [shape: f32[32,32], index: 1, kind: input, shape index: {}]   ;;  %s1228_s2 = inlined_call_operand.vmem [shape: f32[1,32], index: 2, kind: input, shape index: {}]   ;;  %s1229_s3 = inlined_call_operand.vmem [shape: f32[1,32], index: 3, kind: input, shape index: {}]   ;;  %s1230_s4 = inlined_call_operand.vmem [shape: f32[1,32], index: 4, kind: input, shape index: {}]   ;;  %s1231_s5 = inlined_call_operand.hbm [shape: f32[32,128], index: 5, kind: input, shape index: {}]   ;;  %s1232_s6 = inlined_call_operand.vmem [shape: f32[1,128], index: 6, kind: input, shape index: {}]   ;;  %s1233_s7 = inlined_call_operand.hbm [shape: f32[16,128], index: 7, kind: output, shape index: {}]  }
   0x1   :  { %14 = vsyncpa [#allocation3 + $0x1], 0 }
   0x2   :  { %15 = vsyncpa [#allocation6], 0 }
   0x3   :  { %16 = vsyncpa [#allocation4], 0 }
   0x4   :  { %18 = vsyncpa [#allocation4 + $0x1], 0  ;;  %s977_s24 = smov 0   ;;  %s979_s25 = smov 0  }
   0x5   :  { %s981_s26 = smov 0   ;;  %s983_s27 = smov 0  }
   0x6 LB: > { %s998_s28 = sadd.s32 4294967295, %s926_s27   ;;  %s630_s29 = sadd.s32 4294967294, %s926_s27   ;;  %s926_s27 = sphi %s983_s27, %s1253_s27   ;;  %s922_s26 = sphi %s981_s26, %s1252_s26   ;;  %s918_s25 = sphi %s979_s25, %s1251_s25   ;;  %s914_s24 = sphi %s977_s24, %s1250_s24  }
   0x7   : > { %p44_p0 = scmp.ne.s32.totalorder %s918_s25, %s914_s24  ;;  %p1234_p1 = scmp.eq.s32.totalorder %s998_s28, 0 }
   0x8   : > { %p200_p3 = scmp.eq.s32.totalorder %s630_s29, 1  ;;  %p631_p5 = scmp.ge.s32.totalorder %s926_s27, 1 }
   0x9   : > { %p1007_p4 = por %p1234_p1, %p44_p0  ;;  %p207_p7 = scmp.lt.s32.totalorder %s926_s27, 3 }
   0xa   : > { %p1012_p6 = por %p200_p3, %p44_p0  ;;  %s928_s10 = smov [#allocation5]  }
   0xb   : > { %s1237_s30 = scalar_select %p1007_p4, 1, 0 }
   0xc   : > { %s1238_s8 = scalar_select %p1012_p6, 1, 0 }
   0xd   : > { %p1017_p8 = pnand %p631_p5, %p207_p7  ;;  %s219_s11 = sshll.u32 %s928_s10, 4  ;;  %s1021_s11 = int_to_ptr.vmem [resolvable:$true] %s219_s11 }
   0xe   : > { %s929_s13 = smov [#allocation7]   ;;  %s770_s17 = scalar_lea.hbm %s1227_s1, 512 }
   0xf   : > { %p708_p9 = pneg %p1017_p8  ;;  %s241_s14 = sshll.u32 %s929_s13, 4  ;;  %s1032_s14 = int_to_ptr.vmem [resolvable:$true] %s241_s14 }
  0x10   : > { %p771_p12 = scmp.ne.s32.totalorder %s1227_s1, %s770_s17  ;;  %p777_p5 = scmp.lt.u32.totalorder %s770_s17, %s1227_s1 }
  0x11   : > { %p1028_p11 = pnand %p708_p9, %p1234_p1 }
  0x13   : > { %p772_p13 = pneg %p1028_p11 }
  0x15   : > { %p773_p0 = pnand %p772_p13, %p771_p12 }
  0x17   : > { %p774_p3 = pneg %p773_p0 }
  0x19   : > { %p779_p7 = pnand %p777_p5, %p774_p3 }
  0x1b   : > { %782 = shalt.err (!%p779_p7)
}
  0x1c   : > { %s783_s22 = scalar_lea.vmem %s1021_s11, 512  ;;  %p791_p2 = scmp.lt.s32.totalorder %s1021_s11, %s1021_s11 }
  0x1d   : > { %p784_p9 = scmp.ne.s32.totalorder %s1021_s11, %s783_s22  ;;  %p792_p12 = scmp.lt.s32.totalorder %s783_s22, %s783_s22 }
  0x1f   : > { %p786_p10 = pnand %p784_p9, %p772_p13  ;;  %p793_p0 = por %p792_p12, %p791_p2 }
  0x21   : > { %p787_p1 = pneg %p786_p10 }
  0x23   : > { %p794_p6 = pnand %p793_p0, %p787_p1 }
  0x25   : > { %797 = shalt.err (!%p794_p6)
}
  0x26   : > { %s930_s23 = smov 128   ;;  %s931_s29 = smov 8  }
  0x27   : > { %711 = dma.hbm_to_vmem [thread:$0]  (!%p1028_p11), %s1227_s1, 512, %s1021_s11, [#allocation6], %s930_s23, %s930_s23, %s931_s29  }
  0x28   : > { %s798_s17 = scalar_lea.hbm %s1231_s5, 512 }
  0x29   : > { %p799_p2 = scmp.ne.s32.totalorder %s1231_s5, %s798_s17  ;;  %p805_p10 = scmp.lt.u32.totalorder %s798_s17, %s1231_s5 }
  0x2b   : > { %p801_p1 = pnand %p799_p2, %p772_p13 }
  0x2d   : > { %p802_p6 = pneg %p801_p1 }
  0x2f   : > { %p807_p3 = pnand %p805_p10, %p802_p6 }
  0x31   : > { %810 = shalt.err (!%p807_p3)
}
  0x32   : > { %s811_s11 = scalar_lea.vmem %s1032_s14, 512  ;;  %p819_p12 = scmp.lt.s32.totalorder %s1032_s14, %s1032_s14 }
  0x33   : > { %p812_p5 = scmp.ne.s32.totalorder %s1032_s14, %s811_s11  ;;  %p820_p0 = scmp.lt.s32.totalorder %s811_s11, %s811_s11 }
  0x35   : > { %p814_p7 = pnand %p812_p5, %p772_p13  ;;  %p821_p2 = por %p820_p0, %p819_p12 }
  0x37   : > { %p815_p9 = pneg %p814_p7 }
  0x39   : > { %p822_p1 = pnand %p821_p2, %p815_p9 }
  0x3b   : > { %825 = shalt.err (!%p822_p1)
}
  0x3c   : > { %714 = dma.hbm_to_vmem [thread:$0]  (!%p1028_p11), %s1231_s5, 512, %s1032_s14, [#allocation6], %s930_s23, %s930_s23, %s931_s29  }
  0x3d   : > { %s1087_s13 = sadd.s32 1, %s926_s27   ;;  %s31_s12 = sadd.s32 1, %s922_s26 }
  0x3e   : > { %s28_s15 = ssub.s32 %s926_s27, %s1087_s13  ;;  %p38_p13 = scmp.ne.s32.totalorder %s922_s26, %s918_s25 }
  0x3f   : > { %p29_p6 = scmp.eq.s32.totalorder %s28_s15, 0  ;;  %p39_p10 = scmp.eq.s32.totalorder %s926_s27, 0 }
  0x40   : > { %p1241_p3 = scmp.eq.s32.totalorder %s998_s28, 1  ;;  %p725_p7 = scmp.lt.s32.totalorder %s926_s27, 2 }
  0x41   : > { %s1103_s17 = scalar_select %p29_p6, %s922_s26, %s31_s12  }
  0x42   : > { %p1097_p5 = por %p1241_p3, %p38_p13  ;;  %p40_p9 = por %p39_p10, %p38_p13 }
  0x43   : > { %s258_s18 = sand.u32 1, %s922_s26   ;;  %s636_s14 = sshll.u32 %s926_s27, 7 }
  0x44   : > { %s1242_s16 = scalar_select %p1097_p5, 1, 0 }
  0x45   : > { %s635_s19 = sshll.u32 %s258_s18, 3  ;;  %s1110_s20 = scalar_lea.hbm %s1226_s0, %s636_s14 }
  0x46   : > { %s262_s21 = scalar_lea.vmem [#allocation2], %s635_s19  ;;  %p1114_p11 = pnand %p725_p7, %p40_p9 }
  0x47   : > { %s269_s11 = sshll.u32 %s262_s21, 4  ;;  %s259_s10 = scalar_lea.sflag [#allocation3], %s258_s18  ;;  %s1112_s11 = int_to_ptr.vmem [resolvable:$true] %s269_s11 }
  0x48   : > { %s826_s12 = scalar_lea.hbm %s1110_s20, 128  ;;  %p828_p0 = pneg %p1114_p11 }
  0x49   : > { %p827_p12 = scmp.ne.s32.totalorder %s1110_s20, %s826_s12  ;;  %s831_s14 = scalar_lea.hbm %s1226_s0, 256 }
  0x4a   : > { %p832_p13 = scmp.lt.u32.totalorder %s1110_s20, %s1226_s0  ;;  %p833_p6 = scmp.lt.u32.totalorder %s831_s14, %s826_s12 }
  0x4b   : > { %p829_p2 = pnand %p828_p0, %p827_p12  ;;  %p835_p3 = scmp.lt.u32.totalorder %s826_s12, %s1110_s20 }
  0x4c   : > { %p834_p10 = por %p833_p6, %p832_p13 }
  0x4d   : > { %p830_p1 = pneg %p829_p2 }
  0x4e   : > { %p836_p7 = por %p835_p3, %p834_p10 }
  0x50   : > { %p837_p9 = pnand %p836_p7, %p830_p1 }
  0x52   : > { %840 = shalt.err (!%p837_p9)
}
  0x53   : > { %s841_s18 = scalar_lea.vmem %s1112_s11, 128  ;;  %s932_s21 = smov [#allocation2]  }
  0x54   : > { %p842_p12 = scmp.ne.s32.totalorder %s1112_s11, %s841_s18  ;;  %s846_s15 = sshll.u32 %s932_s21, 4  ;;  %s847_s15 = int_to_ptr.vmem [resolvable:$false] %s846_s15 }
  0x55   : > { %s848_s19 = scalar_lea.vmem %s847_s15, 256  ;;  %p849_p4 = scmp.lt.s32.totalorder %s1112_s11, %s847_s15 }
  0x56   : > { %p844_p2 = pnand %p842_p12, %p828_p0  ;;  %p850_p13 = scmp.lt.s32.totalorder %s848_s19, %s841_s18 }
  0x58   : > { %p845_p5 = pneg %p844_p2  ;;  %p851_p6 = por %p850_p13, %p849_p4 }
  0x5a   : > { %p852_p10 = pnand %p851_p6, %p845_p5 }
  0x5c   : > { %855 = shalt.err (!%p852_p10)
}
  0x5d   : > { %718 = dma.hbm_to_vmem [thread:$0]  (!%p1114_p11), %s1110_s20, 128, %s1112_s11, %s259_s10  }
  0x5e   : > { %278 = sbr.rel (%p1017_p8) target bundleno = 731 (0x2db), region = 48  ;;  %s1146_s12 = sand.u32 (!%p1017_p8), 1, %s918_s25  }
  0x5f   : > { %s638_s14 = sshll.u32 (!%p1017_p8), %s1146_s12, 3  ;;  %s281_s23 = scalar_lea.sflag (!%p1017_p8), [#allocation3], %s1146_s12 }
  0x60   : > { %s284_s29 = scalar_lea.vmem (!%p1017_p8), [#allocation2], %s638_s14  ;;  %p1244_p4 = scmp.ne.s32.totalorder (!%p1017_p8), %s1237_s30, 0 }
  0x65   : > { %901 = dma.done.wait (%p1244_p4), %s281_s23, 128  }
  0x66   : > { %903 = vsyncadd (%p1244_p4), %s281_s23, 4294967168  ;;  %p1245_p5 = scmp.eq.s32.totalorder %s998_s28, 0 }
  0x68   : > { %905 = dma.done.wait (%p1245_p5), [#allocation6], 1024   ;;  %p1246_p8 = pmov %p1245_p5 }
  0x69   : > { %v933_v0 = vmov 0.0|0.0   ;;  %vm934_vm0 = vmmov 0   ;;  %v935_v1 = vmov 0.0   ;;  %v324_v2 = vld [vmem:[#allocation5] sm:$0xff]  ;;  %v325_v3 = vld [vmem:[#allocation5 + $0x8] sm:$0xff]  ;;  %v326_v4 = vld [vmem:[#allocation5 + $0x10] sm:$0xff] }
  0x6a   : > { %907 = vsyncadd (%p1246_p8), [#allocation6], 4294966272  ;;  %684 = vmatprep.subr.bf16.mxu0 %v933_v0  ;;  %670 = vmatprep.mubr.msk.f32.mxu0 %vm934_vm0, %v935_v1  ;;  %v685_v5 = vpack.c.bf16 %v325_v3, %v324_v2  ;;  %v327_v6 = vld [vmem:[#allocation5 + $0x18] sm:$0xff]  ;;  %vm335_vm1 = vcmask 261120   ;;  %v642_v9 = vld [vmem:[%s1228_s2] ss:$0 sm:$0xff] }
  0x6b   : > { %690 = vmatprep.subr.bf16.mxu1 %v933_v0  ;;  %681 = vmatprep.mubr.msk.f32.mxu1 %vm934_vm0, %v935_v1  ;;  %v688_v7 = vpack.c.bf16 %v327_v6, %v326_v4  ;;  %v323_v8 = vld [vmem:[%s284_s29] sm:$0xff]  ;;  %v442_v17 = vld [vmem:[#allocation7] sm:$0xff]  ;;  %v443_v18 = vld [vmem:[#allocation7 + $0x8] sm:$0xff]  ;;  %s649_s15 = sshll.u32 %s998_s28, 7  ;;  %s322_s19 = scalar_lea.vmem [#allocation8], %s638_s14 }
  0x6c   : > { %686 = vmatpush3.bf16.msra.mxu0 %v685_v5  ;;  %v444_v19 = vld [vmem:[#allocation7 + $0x10] sm:$0xff]  ;;  %v691_v20 = vpack.c.bf16 %v443_v18, %v442_v17  ;;  %v445_v21 = vld [vmem:[#allocation7 + $0x18] sm:$0xff]  ;;  %s541_s23 = sshll.u32 %s322_s19, 4  ;;  %s1182_s9 = scalar_lea.hbm %s1233_s7, %s649_s15  ;;  %s1184_s23 = int_to_ptr.vmem [resolvable:$true] %s541_s23 }
  0x6d   : > { %687 = vmatprep.subr.bf16.mxu0 %v933_v0  ;;  %v694_v22 = vpack.c.bf16 %v445_v21, %v444_v19  ;;  %v644_v33 = vld [vmem:[%s1229_s3] ss:$0 sm:$0xff]  ;;  %s528_s20 = scalar_lea.sflag [#allocation4], %s1146_s12  ;;  %s856_s11 = scalar_lea.vmem %s1184_s23, 128 }
  0x6e   : > { %692 = vmatpush3.bf16.msra.mxu1 %v691_v20  ;;  %v645_v35 = vld [vmem:[%s1230_s4] ss:$0 sm:$0xff]  ;;  %p857_p11 = scmp.ne.s32.totalorder %s1184_s23, %s856_s11  ;;  %p1247_p0 = scmp.ne.s32.totalorder %s1242_s16, 0 }
  0x6f   : > { %693 = vmatprep.subr.bf16.mxu1 %v933_v0  ;;  %v646_v38 = vld [vmem:[%s1232_s6] ss:$0 sm:$0xff]  ;;  %s936_s28 = smov [#allocation8]  }
  0x70   : > { %689 = vmatpush3.bf16.msra.mxu0 %v688_v7  ;;  %p858_p1 = pnand %p857_p11, %p1247_p0  ;;  %s860_s14 = sshll.u32 %s936_s28, 4  ;;  %s861_s14 = int_to_ptr.vmem [resolvable:$false] %s860_s14 }
  0x71   : > { %s862_s22 = scalar_lea.vmem %s861_s14, 256  ;;  %p863_p7 = scmp.lt.s32.totalorder %s1184_s23, %s861_s14 }
  0x72   : > { %695 = vmatpush3.bf16.msra.mxu1 %v694_v22  ;;  %p859_p3 = pneg %p858_p1  ;;  %p864_p9 = scmp.lt.s32.totalorder %s862_s22, %s856_s11 }
  0x73   : > { %671 = vmatmul.mubr.msk.f32.vlgmr.msra.gmra.mrb[0].mxu0 %vm335_vm1, %v323_v8 }
  0x74   : > { %p865_p12 = por %p864_p9, %p863_p7 }
  0x76   : > { %p866_p2 = pnand %p865_p12, %p859_p3 }
 0x146   : > { %v405_v10 = vpop.f32.mrb[0].mxu0 }
 0x147   : > { %v406_v11 = vadd.f32 %v642_v9, %v405_v10  ;;  %v672_v12 = vpop.f32.mrb[1].mxu0 }
 0x149   : > { %v409_v13 = vmax.f32 %v406_v11, 0.0 }
 0x14b   : > { %v410_v14 = vsel %vm335_vm1, %v409_v13, 0.0  ;;  %v413_v15 = vmul.f32 %v409_v13, %v409_v13 }
 0x14c   : > { %411 = vadd.xlane.f32.xlu0 %v410_v14 }
 0x14d   : > { %v414_v16 = vsel %vm335_vm1, %v413_v15, 0.0 }
 0x150   : > { %415 = vadd.xlane.f32.xlu0 %v414_v16 }
 0x1d9   : > { %v412_v23 = vpop.xlane.xlu0 %411 }
 0x1da   : > { %v417_v24 = vmul.f32 0.03125, %v412_v23 }
 0x1dc   : > { %v419_v26 = vmul.f32 %v417_v24, %v417_v24  ;;  %v424_v31 = vsub.f32 %v409_v13, %v417_v24 }
 0x1dd   : > { %v416_v25 = vpop.xlane.xlu0 %415 }
 0x1de   : > { %v418_v27 = vmul.f32 0.03125, %v416_v25 }
 0x1e0   : > { %v420_v28 = vsub.f32 %v418_v27, %v419_v26 }
 0x1e2   : > { %v421_v29 = vmax.f32 %v420_v28, 0.0 }
 0x1e4   : > { %v422_v30 = vadd.f32 1e-12, %v421_v29 }
 0x1e6   : > { %768 = vrsqrt.f32 %v422_v30 }
 0x1f0   : > { %v769_v32 = vpop.eup %768 }
 0x1f1   : > { %v425_v34 = vmul.f32 %v769_v32, %v424_v31 }
 0x1f3   : > { %v433_v36 = vmul.f32 %v644_v33, %v425_v34 }
 0x1f5   : > { %v441_v37 = vadd.f32 %v645_v35, %v433_v36 }
 0x1f7   : > { %682 = vmatmul.mubr.msk.f32.vlgmr.msra.gmra.mrb[0].mxu1 %vm335_vm1, %v441_v37 }
 0x2ca   : > { %v522_v39 = vpop.f32.mrb[0].mxu1 }
 0x2cb   : > { %v523_v40 = vadd.f32 %v646_v38, %v522_v39  ;;  %v683_v41 = vpop.f32.mrb[1].mxu1 }
 0x2cd   : > { %526 = vst [vmem:[%s322_s19] sm:$0xff] %v523_v40 }
 0x2ce   : > { %869 = shalt.err (!%p866_p2)
}
 0x2cf   : > { %s870_s12 = scalar_lea.hbm %s1182_s9, 128  ;;  %s874_s21 = scalar_lea.hbm %s1233_s7, 256 }
 0x2d0   : > { %p871_p13 = scmp.ne.s32.totalorder %s1182_s9, %s870_s12  ;;  %p875_p4 = scmp.lt.u32.totalorder %s1182_s9, %s1233_s7 }
 0x2d1   : > { %p876_p5 = scmp.lt.u32.totalorder %s874_s21, %s870_s12  ;;  %p878_p11 = scmp.lt.u32.totalorder %s870_s12, %s1182_s9 }
 0x2d2   : > { %p872_p6 = pnand %p871_p13, %p1247_p0 }
 0x2d3   : > { %p877_p8 = por %p876_p5, %p875_p4 }
 0x2d4   : > { %p873_p10 = pneg %p872_p6 }
 0x2d5   : > { %p879_p1 = por %p878_p11, %p877_p8 }
 0x2d7   : > { %p880_p3 = pnand %p879_p1, %p873_p10 }
 0x2d9   : > { %883 = shalt.err (!%p880_p3)
}
 0x2da   : > { %706 = dma.vmem_to_hbm [thread:$0]  (%p1247_p0), %s1184_s23, 128, %s1182_s9, %s528_s20  }
 0x2db PF: > { %s553_s29 = sand.u32 1, %s914_s24   ;;  %p1248_p7 = scmp.ne.s32.totalorder %s1238_s8, 0 }
 0x2dc   : > { %p1249_p9 = scmp.ge.s32.totalorder %s926_s27, 2  ;;  %s554_s30 = scalar_lea.sflag [#allocation4], %s553_s29 }
 0x2de   : > { %p720_p12 = pnand %p1249_p9, %p1248_p7 }
 0x2e0   : > { %909 = dma.done.wait (!%p720_p12), %s554_s30, 128  }
 0x2e1   : > { %911 = vsyncadd (!%p720_p12), %s554_s30, 4294967168  ;;  %p21_p2 = scmp.ge.s32.totalorder %s1087_s13, 4   ;;  %s1250_s24 = smov %s918_s25 }
 0x2e2   : > { %s1251_s25 = smov %s922_s26  ;;  %s1252_s26 = smov %s1103_s17 }
 0x2e3   : > { %s1253_s27 = smov %s1087_s13  ;;  %23 = sbr.rel (!%p21_p2) target bundleno = 6 (0x6), region = 101 }
 0x2ea   :  { %559 = vsyncpa [#allocation3], 1 }
 0x2eb   :  { %561 = vsyncpa [#allocation3 + $0x1], 1 }
 0x2ec   :  { %562 = vsyncpa [#allocation6], 1 }
 0x2ed   :  { %563 = vsyncpa [#allocation4], 1 }
 0x2ee   :  { %565 = vsyncpa [#allocation4 + $0x1], 1 }

</bundles_post_ra>
